<compile_context>
chip_gen: v6e
topology: v6e:2x2x1
jax: 0.10.0
libtpu: 0.0.40
codegen_flags: <defaults>
</compile_context>

<pallas_src>
import math

import jax
import jax.numpy as jnp
from jax.experimental import pallas as pl
from jax.experimental.pallas import tpu as pltpu


# ----------------------------------------------------------------------------- kernel ---
def _intensity_kernel(re_ref, im_ref, o_ref):
    re = re_ref[...]
    im = im_ref[...]
    # |u|^2 == re^2 + im^2 (exact semantics of torch.abs(u) ** 2 for complex u)
    o_ref[...] = re * re + im * im


# --------------------------------------------------------------------------- wrapper ----
_LANE = 128
_MAX_LANE_WIDTH = 1024   # lane-dense target width (multiple of 128)
_MAX_BLOCK_ROWS = 256    # 256 x 1024 x f32 = 1 MiB per operand block (~85% HBM roofline)


def _choose_lane_dense_cols(total):
    """Largest of {1024, 512, 256, 128} that divides `total`, else None."""
    for cols in (_MAX_LANE_WIDTH, 512, 256, _LANE):
        if total % cols == 0:
            return cols
    return None


def _pallas_intensity_2d(re2, im2, block_rows):
    rows, cols = re2.shape
    grid = (pl.cdiv(rows, block_rows),)
    total = rows * cols
    cost = pl.CostEstimate(
        flops=3 * total,            # 2 mults + 1 add per element
        transcendentals=0,
        bytes_accessed=12 * total,  # kernel traffic: read 4+4, write 4 B/elem
    )
    return pl.pallas_call(
        _intensity_kernel,
        out_shape=jax.ShapeDtypeStruct((rows, cols), jnp.float32),
        grid_spec=pltpu.PrefetchScalarGridSpec(
            num_scalar_prefetch=0,
            grid=grid,
            in_specs=[
                pl.BlockSpec((block_rows, cols), lambda i: (i, 0)),
                pl.BlockSpec((block_rows, cols), lambda i: (i, 0)),
            ],
            out_specs=pl.BlockSpec((block_rows, cols), lambda i: (i, 0)),
        ),
        compiler_params=pltpu.CompilerParams(
            dimension_semantics=("parallel",),
            vmem_limit_bytes=32 * 1024 * 1024,
        ),
        cost_estimate=cost,
    )(re2, im2)


@jax.jit
def imaging_layer(u):
    """
    u: complex64 array of shape (N, C, H, W)  (NCHW, like the PyTorch module)
    returns: float32 array of the same shape with the intensity |u|^2
    """
    orig_shape = u.shape
    re = jnp.real(u).astype(jnp.float32)
    im = jnp.imag(u).astype(jnp.float32)

    total = math.prod(orig_shape) if len(orig_shape) else 1
    cols = _choose_lane_dense_cols(total)

    if cols is None:
        # Fallback for totals not divisible by 128: keep the last (contiguous) dim as
        # lanes and use full-extent / 8-multiple row blocks (still valid BlockSpecs).
        cols = orig_shape[-1] if len(orig_shape) else 1
        rows = total // cols
        block_rows = rows if rows <= 256 else 256
    else:
        rows = total // cols
        block_rows = rows if rows <= _MAX_BLOCK_ROWS else _MAX_BLOCK_ROWS

    out2 = _pallas_intensity_2d(re.reshape(rows, cols),
                                im.reshape(rows, cols),
                                block_rows)
    return out2.reshape(orig_shape)


# ------------------------------------------------------------------------------ demo ----
if __name__ == "__main__":
    key = jax.random.PRNGKey(0)
    k_re, k_im = jax.random.split(key)
    N, C, H, W = 2, 4, 16, 16
    u_re = jax.random.normal(k_re, (N, C, H, W), dtype=jnp.float32)
    u_im = jax.random.normal(k_im, (N, C, H, W), dtype=jnp.float32)
    u = (u_re + 1j * u_im).astype(jnp.complex64)

    out = imaging_layer(u)
    out = jax.block_until_ready(out)

    # Reference check against plain JAX (matches torch.abs(u) ** 2).
    ref = jnp.abs(u) ** 2
    assert out.shape == (N, C, H, W)
    assert out.dtype == jnp.float32
    assert jnp.allclose(out, ref, atol=1e-5, rtol=1e-5)

    print("KERNEL_OK")
</pallas_src>

<mosaic_0001>
module attributes {stable_mosaic.version = 11 : i64} {
  func.func @_intensity_kernel(%arg0: i32, %arg1: memref<2x1024xf32, #tpu.memory_space<vmem>>, %arg2: memref<2x1024xf32, #tpu.memory_space<vmem>>, %arg3: memref<2x1024xf32, #tpu.memory_space<vmem>>) attributes {dimension_semantics = [#tpu.dimension_semantics<parallel>], iteration_bounds = array<i64: 1>, scalar_prefetch = 0 : i64, scratch_operands = 0 : i64, tpu.core_type = #tpu.core_type<tc>, window_params = [{transform_indices = @transform_0, window_bounds = array<i64: 2, 1024>}, {transform_indices = @transform_1, window_bounds = array<i64: 2, 1024>}, {transform_indices = @transform_2, window_bounds = array<i64: 2, 1024>}]} {
    %c0 = arith.constant 0 : index
    %c0_0 = arith.constant 0 : index
    %0 = vector.load %arg1[%c0, %c0_0] : memref<2x1024xf32, #tpu.memory_space<vmem>>, vector<2x1024xf32>
    %c0_1 = arith.constant 0 : index
    %c0_2 = arith.constant 0 : index
    %1 = vector.load %arg2[%c0_1, %c0_2] : memref<2x1024xf32, #tpu.memory_space<vmem>>, vector<2x1024xf32>
    %2 = arith.mulf %0, %0 : vector<2x1024xf32>
    %3 = arith.mulf %1, %1 : vector<2x1024xf32>
    %4 = arith.addf %2, %3 : vector<2x1024xf32>
    %c0_3 = arith.constant 0 : index
    %c0_4 = arith.constant 0 : index
    %5 = vector.load %arg3[%c0_3, %c0_4] : memref<2x1024xf32, #tpu.memory_space<vmem>>, vector<2x1024xf32>
    tpu.vector_store %arg3[%c0_3, %c0_4], %4 {strides = array<i32>} : memref<2x1024xf32, #tpu.memory_space<vmem>>, vector<2x1024xf32>,
    return
  }
  func.func @transform_0(%arg0: i32) -> (i32, i32) {
    %c0_i32 = arith.constant 0 : i32
    %c0_i32_0 = arith.constant 0 : i32
    return %arg0, %c0_i32 : i32, i32
  }
  func.func @transform_1(%arg0: i32) -> (i32, i32) {
    %c0_i32 = arith.constant 0 : i32
    %c0_i32_0 = arith.constant 0 : i32
    return %arg0, %c0_i32 : i32, i32
  }
  func.func @transform_2(%arg0: i32) -> (i32, i32) {
    %c0_i32 = arith.constant 0 : i32
    %c0_i32_0 = arith.constant 0 : i32
    return %arg0, %c0_i32 : i32, i32
  }
}

</mosaic_0001>

<bundles_post_ra>
// kernel: custom-call
= control target key start
LH: loop header
LB: loop body
LE: loop exit
PB: predicated region body
PF: predicated region fallthrough
CT: control target
= control target key end

     0   :  { %2 = vsyncpa [#allocation0], 0  ;;  %s47_s0 = inlined_call_operand.hbm [shape: c64[2,4,16,16], index: 0, kind: input, shape index: {}]   ;;  %s48_s1 = inlined_call_operand.vmem [shape: f32[2,4,16,16], index: 1, kind: output, shape index: {}]  }
   0x1   :  { %s3_s8 = sshll.u32 %s48_s1, 4  ;;  %s4_s8 = int_to_ptr.vmem [resolvable:$true] %s3_s8 }
   0x2   :  { %s17_s9 = scalar_lea.vmem %s4_s8, 2048  ;;  %p22_p1 = scmp.lt.s32.totalorder %s4_s8, %s4_s8 }
   0x3   :  { %p18_p0 = scmp.ne.s32.totalorder %s4_s8, %s17_s9  ;;  %p23_p2 = scmp.lt.s32.totalorder %s17_s9, %s17_s9 }
   0x5   :  { %p24_p3 = por %p23_p2, %p22_p1 }
   0x7   :  { %p25_p4 = pnand %p24_p3, %p18_p0 }
   0x9   :  { %28 = shalt.err (!%p25_p4)  }
   0xa   :  { %6 = dma.hbm_to_vmem [thread:$0]  %s47_s0, 2048, %s4_s8, [#allocation0] }
   0xb   :  { %29 = dma.done.wait [#allocation0], 2048  }
   0xc   :  { %30 = vsyncadd [#allocation0], 4294965248 }
   0xd   :  { %8 = vsyncpa [#allocation0], 1 }

// kernel: custom-call.1
= control target key start
LH: loop header
LB: loop body
LE: loop exit
PB: predicated region body
PF: predicated region fallthrough
CT: control target
= control target key end

     0   :  { %s51_s0 = inlined_call_operand.hbm [shape: c64[2,4,16,16], index: 0, kind: input, shape index: {}]   ;;  %s52_s1 = inlined_call_operand.vmem [shape: f32[2,4,16,16], index: 1, kind: output, shape index: {}]  }
   0x1   :  { %s2_s8 = scalar_lea.hbm %s51_s0, 2048 }
   0x2   :  { %3 = vsyncpa [#allocation0], 0  ;;  %s4_s11 = sshll.u32 %s52_s1, 4  ;;  %s5_s11 = int_to_ptr.vmem [resolvable:$true] %s4_s11 }
   0x3   :  { %s20_s12 = scalar_lea.vmem %s5_s11, 2048  ;;  %p25_p1 = scmp.lt.s32.totalorder %s5_s11, %s5_s11 }
   0x4   :  { %p21_p0 = scmp.ne.s32.totalorder %s5_s11, %s20_s12  ;;  %p26_p2 = scmp.lt.s32.totalorder %s20_s12, %s20_s12 }
   0x6   :  { %p27_p3 = por %p26_p2, %p25_p1 }
   0x8   :  { %p28_p4 = pnand %p27_p3, %p21_p0 }
   0xa   :  { %31 = shalt.err (!%p28_p4)  }
   0xb   :  { %7 = dma.hbm_to_vmem [thread:$0]  %s2_s8, 2048, %s5_s11, [#allocation0] }
   0xc   :  { %33 = dma.done.wait [#allocation0], 2048  }
   0xd   :  { %34 = vsyncadd [#allocation0], 4294965248 }
   0xe   :  { %9 = vsyncpa [#allocation0], 1 }

// kernel: imaging_layer.1
= control target key start
LH: loop header
LB: loop body
LE: loop exit
PB: predicated region body
PF: predicated region fallthrough
CT: control target
= control target key end

     0   :  { %s60_s0 = inlined_call_operand.vmem [shape: f32[2,1024], index: 0, kind: input, shape index: {}]   ;;  %s61_s1 = inlined_call_operand.vmem [shape: f32[2,1024], index: 1, kind: input, shape index: {}]   ;;  %s62_s2 = inlined_call_operand.vmem [shape: f32[2,1024], index: 2, kind: output, shape index: {}]  }
   0x1   :  { %v11_v0 = vld [vmem:[%s60_s0] sm:$0xff]  ;;  %v12_v2 = vld [vmem:[%s60_s0 + $0x8] sm:$0xff] }
   0x2   :  { %v13_v1 = vld [vmem:[%s61_s1] sm:$0xff]  ;;  %v15_v3 = vmul.f32 %v11_v0, %v11_v0  ;;  %v14_v5 = vld [vmem:[%s61_s1 + $0x8] sm:$0xff]  ;;  %v16_v6 = vmul.f32 %v12_v2, %v12_v2 }
   0x3   :  { %v17_v4 = vmul.f32 %v13_v1, %v13_v1  ;;  %v18_v7 = vmul.f32 %v14_v5, %v14_v5 }
   0x5   :  { %v19_v8 = vadd.f32 %v17_v4, %v15_v3  ;;  %v20_v9 = vadd.f32 %v18_v7, %v16_v6 }
   0x7   :  { %21 = vst [vmem:[%s62_s2] sm:$0xff] %v19_v8  ;;  %22 = vst [vmem:[%s62_s2 + $0x8] sm:$0xff] %v20_v9 }

</bundles_post_ra>
